<compile_context>
chip_gen: v5e
topology: v5e:2x2
jax: 0.10.0
libtpu: 0.0.40
codegen_flags: <defaults>
</compile_context>

<pallas_src>
import math

import jax
import jax.numpy as jnp
from jax.experimental import pallas as pl
from jax.experimental.pallas import tpu as pltpu


# ----------------------------------------------------------------------------
# PE table construction (parameter/buffer setup = plain-JAX glue).
# ----------------------------------------------------------------------------
def make_positional_encoding_table(d_model: int, max_len: int = 5000) -> jnp.ndarray:
    """Build the (1, max_len, d_model) sinusoidal PE buffer, matching PyTorch."""
    position = jnp.arange(0, max_len, dtype=jnp.float32)[:, None]           # (max_len, 1)
    div_term = jnp.exp(
        jnp.arange(0, d_model, 2, dtype=jnp.float32) * -(math.log(10000.0) / d_model)
    )                                                                        # (ceil(d/2),)
    angles = position * div_term                                             # (max_len, ceil(d/2))
    pe = jnp.zeros((max_len, d_model), dtype=jnp.float32)
    pe = pe.at[:, 0::2].set(jnp.sin(angles))
    # Robust for odd d_model (cos has ceil(d/2) cols but only floor(d/2) slots);
    # identical to PyTorch for even d_model.
    pe = pe.at[:, 1::2].set(jnp.cos(angles)[:, : d_model // 2])
    return pe[None, :, :]                                                    # (1, max_len, d_model)


# ----------------------------------------------------------------------------
# Kernel: lane-dense broadcast add on a (B, tc) tile.
# ----------------------------------------------------------------------------
def _pe_add_kernel(x_ref, pe_ref, o_ref):
    # x_ref/o_ref: (B, tc); pe_ref: (1, tc) -> sublane-broadcast add on the VPU.
    o_ref[...] = x_ref[...] + pe_ref[...]


# Budget for all double-buffered tiles (x, pe, out). Conservative enough for the
# v7x 64 MiB VMEM; v5e/v6e have 128 MiB so this is trivially fine there too.
_TILE_VMEM_BUDGET = 24 * 1024 * 1024
_VMEM_LIMIT_BYTES = 48 * 1024 * 1024


def _choose_col_tile(batch: int, flat_cols: int, itemsize: int) -> int:
    """Largest multiple-of-128 column tile whose double-buffered x/pe/out tiles
    fit the VMEM budget; falls back to the full row when it already fits."""
    # bytes per column of flattened rows: x (B) + out (B) + pe (1), double-buffered.
    per_col = 2 * (2 * batch + 1) * itemsize
    tc = max(128, (_TILE_VMEM_BUDGET // per_col) // 128 * 128)
    if tc >= flat_cols:
        return flat_cols       # single full-extent block (also handles S*D < 128)
    return tc                  # multiple of 128; ragged tail masked by Pallas


def positional_encoding_forward(x: jnp.ndarray, pe: jnp.ndarray) -> jnp.ndarray:
    """x: (B, S, D); pe: (1, max_len, D). Returns x + pe[:, :S, :] in x.dtype."""
    B, S, D = x.shape
    SD = S * D

    # Lane-dense 2-D views (free reshapes): last dim is S*D.
    x_flat = x.reshape(B, SD)
    pe_flat = pe[:, :S, :].astype(x.dtype).reshape(1, SD)

    tc = _choose_col_tile(B, SD, jnp.dtype(x.dtype).itemsize)
    n_c = pl.cdiv(SD, tc)

    out_flat = pl.pallas_call(
        _pe_add_kernel,
        out_shape=jax.ShapeDtypeStruct((B, SD), x.dtype),
        grid_spec=pltpu.PrefetchScalarGridSpec(
            num_scalar_prefetch=0,
            grid=(n_c,),
            in_specs=[
                pl.BlockSpec((B, tc), lambda c: (0, c)),   # x: all batch rows, one column tile
                pl.BlockSpec((1, tc), lambda c: (0, c)),   # pe: fetched once per column tile
            ],
            out_specs=pl.BlockSpec((B, tc), lambda c: (0, c)),
        ),
        compiler_params=pltpu.CompilerParams(
            dimension_semantics=("parallel",),             # shard across v7x's 2 TCs
            vmem_limit_bytes=_VMEM_LIMIT_BYTES,
        ),
    )(x_flat, pe_flat)

    return out_flat.reshape(B, S, D)


if __name__ == "__main__":
    B, S, D = 2, 8, 32
    max_len = 64  # small synthetic max_len (>= S); semantics identical to 5000

    key = jax.random.PRNGKey(0)
    x = jax.random.normal(key, (B, S, D), dtype=jnp.float32)

    pe = make_positional_encoding_table(D, max_len)

    out = positional_encoding_forward(x, pe)
    out = jax.block_until_ready(out)

    # Reference check (plain JAX broadcasting, mirrors the PyTorch forward).
    ref = x + pe[:, :S, :]
    assert out.shape == (B, S, D)
    assert jnp.allclose(out, ref, atol=1e-6), "mismatch vs reference"

    print("KERNEL_OK")
</pallas_src>

<mosaic_0001>
module attributes {stable_mosaic.version = 11 : i64} {
  func.func @_pe_add_kernel(%arg0: i32, %arg1: memref<2x256xf32, #tpu.memory_space<vmem>>, %arg2: memref<1x256xf32, #tpu.memory_space<vmem>>, %arg3: memref<2x256xf32, #tpu.memory_space<vmem>>) attributes {dimension_semantics = [#tpu.dimension_semantics<parallel>], iteration_bounds = array<i64: 1>, scalar_prefetch = 0 : i64, scratch_operands = 0 : i64, tpu.core_type = #tpu.core_type<tc>, window_params = [{transform_indices = @transform_0, window_bounds = array<i64: 2, 256>}, {transform_indices = @transform_1, window_bounds = array<i64: 1, 256>}, {transform_indices = @transform_2, window_bounds = array<i64: 2, 256>}]} {
    %c0 = arith.constant 0 : index
    %c0_0 = arith.constant 0 : index
    %0 = vector.load %arg1[%c0, %c0_0] : memref<2x256xf32, #tpu.memory_space<vmem>>, vector<2x256xf32>
    %c0_1 = arith.constant 0 : index
    %c0_2 = arith.constant 0 : index
    %1 = vector.load %arg2[%c0_1, %c0_2] : memref<1x256xf32, #tpu.memory_space<vmem>>, vector<1x256xf32>
    %2 = vector.broadcast %1 : vector<1x256xf32> to vector<2x256xf32>
    %3 = arith.addf %0, %2 : vector<2x256xf32>
    %c0_3 = arith.constant 0 : index
    %c0_4 = arith.constant 0 : index
    %4 = vector.load %arg3[%c0_3, %c0_4] : memref<2x256xf32, #tpu.memory_space<vmem>>, vector<2x256xf32>
    tpu.vector_store %arg3[%c0_3, %c0_4], %3 {strides = array<i32>} : memref<2x256xf32, #tpu.memory_space<vmem>>, vector<2x256xf32>,
    return
  }
  func.func @transform_0(%arg0: i32) -> (i32, i32) {
    %c0_i32 = arith.constant 0 : i32
    %c0_i32_0 = arith.constant 0 : i32
    return %c0_i32, %arg0 : i32, i32
  }
  func.func @transform_1(%arg0: i32) -> (i32, i32) {
    %c0_i32 = arith.constant 0 : i32
    %c0_i32_0 = arith.constant 0 : i32
    return %c0_i32, %arg0 : i32, i32
  }
  func.func @transform_2(%arg0: i32) -> (i32, i32) {
    %c0_i32 = arith.constant 0 : i32
    %c0_i32_0 = arith.constant 0 : i32
    return %c0_i32, %arg0 : i32, i32
  }
}

</mosaic_0001>

<bundles_post_ra>
// kernel: tpu_custom_call.1
= control target key start
LH: loop header
LB: loop body
LE: loop exit
PB: predicated region body
PF: predicated region fallthrough
CT: control target
= control target key end

     0   :  { %7 = vsyncpa [#allocation3], 0  ;;  %s177_s0 = inlined_call_operand.hbm [shape: f32[2,256], index: 0, kind: input, shape index: {}]   ;;  %s178_s1 = inlined_call_operand.hbm [shape: f32[1,256], index: 1, kind: input, shape index: {}]   ;;  %s179_s2 = inlined_call_operand.hbm [shape: f32[2,256], index: 2, kind: output, shape index: {}]  }
   0x1   :  { %8 = vsyncpa [#allocation6], 0 }
   0x2   :  { %9 = vsyncpa [#allocation4], 0  ;;  %s15_s11 = sshll.u32 %s177_s0, 4  ;;  %s150_s12 = smov [#allocation2]   ;;  %s16_s11 = int_to_ptr.hbm [resolvable:$true] %s15_s11 }
   0x3   :  { %s17_s13 = sshll.u32 %s150_s12, 4  ;;  %s26_s16 = sshll.u32 %s178_s1, 4  ;;  %s18_s13 = int_to_ptr.vmem [resolvable:$true] %s17_s13  ;;  %s27_s16 = int_to_ptr.hbm [resolvable:$true] %s26_s16 }
   0x4   :  { %20 = dma.hbm_to_vmem [thread:$0]  %s16_s11, 64, %s18_s13, [#allocation3]  }
   0x5   :  { %s151_s17 = smov [#allocation5]  }
   0x6   :  { %s28_s18 = sshll.u32 %s151_s17, 4  ;;  %s29_s18 = int_to_ptr.vmem [resolvable:$true] %s28_s18 }
   0x7   :  { %31 = dma.hbm_to_vmem [thread:$0]  %s27_s16, 32, %s29_s18, [#allocation6]  }
   0x8   :  { %144 = dma.done.wait [#allocation3], 64  }
   0x9   :  { %145 = vsyncadd [#allocation3], 4294967232 }
   0xa   :  { %146 = dma.done.wait [#allocation6], 32  }
   0xb   :  { %147 = vsyncadd [#allocation6], 4294967264  ;;  %v41_v0 = vld [vmem:[#allocation5] sm:$0x3]  ;;  %vm46_vm0 = vcmask 1041408   ;;  %s152_s0 = smov [#allocation7]  }
   0xc   :  { %v43_v1 = vperm.slane %v41_v0, 0  ;;  %v44_v2 = vperm.slane %v41_v0, 1  ;;  %v40_v3 = vld [vmem:[#allocation2] sm:$0xf]  ;;  %s56_s19 = sshll.u32 %s152_s0, 4  ;;  %s58_s21 = sshll.u32 %s179_s2, 4  ;;  %s57_s19 = int_to_ptr.vmem [resolvable:$true] %s56_s19  ;;  %s59_s21 = int_to_ptr.hbm [resolvable:$true] %s58_s21 }
   0xe   :  { %v45_v4 = vrot.slane %v44_v2, 6 }
  0x10   :  { %v47_v5 = vsel %vm46_vm0, %v43_v1, %v45_v4 }
  0x11   :  { %v49_v6 = vadd.f32 %v47_v5, %v40_v3 }
  0x13   :  { %50 = vst [vmem:[#allocation7] sm:$0xf] %v49_v6 }
  0x14   :  { %61 = dma.vmem_to_hbm [thread:$0]  %s57_s19, 64, %s59_s21, [#allocation4]  }
  0x15   :  { %148 = dma.done.wait [#allocation4], 64  }
  0x16   :  { %149 = vsyncadd [#allocation4], 4294967232 }
  0x17   :  { %66 = vsyncpa [#allocation3], 1 }
  0x18   :  { %67 = vsyncpa [#allocation6], 1 }
  0x19   :  { %68 = vsyncpa [#allocation4], 1 }

</bundles_post_ra>
